<compile_context>
chip_gen: v7x
topology: tpu7x:2x2x1
jax: 0.10.0
libtpu: 0.0.40
codegen_flags: <defaults>
</compile_context>

<pallas_src>
import functools

import jax
import jax.numpy as jnp
from jax.experimental import pallas as pl
from jax.experimental.pallas import tpu as pltpu


def _se_kernel(x_ref, w1t_ref, b1_ref, w2t_ref, b2_ref, o_ref, *, inv_hw):
    # x_ref / o_ref: (TB, C, HW) in the input dtype.
    # Squeeze: global average pool with f32 accumulation (no full-tile f32 temp).
    y = jnp.sum(x_ref[...], axis=-1, dtype=jnp.float32) * inv_hw            # (TB, C)

    # Excitation: fc1 -> ReLU -> fc2 -> h_sigmoid, f32 accumulation on the MXU.
    h = jnp.dot(y.astype(w1t_ref.dtype), w1t_ref[...],
                preferred_element_type=jnp.float32)
    h = jnp.maximum(h + b1_ref[...], 0.0)                                    # (TB, Cr)
    s = jnp.dot(h.astype(w2t_ref.dtype), w2t_ref[...],
                preferred_element_type=jnp.float32)
    s = s + b2_ref[...]                                                      # (TB, C)
    scale = jnp.clip(s + 3.0, 0.0, 6.0) * (1.0 / 6.0)                        # (TB, C)

    # Rescale: stream straight from the ref in native dtype, broadcast over HW.
    o_ref[...] = x_ref[...] * scale.astype(o_ref.dtype)[:, :, None]


def _chip_params():
    """Returns (block_budget_bytes, vmem_limit_bytes, is_v7x_like)."""
    vmem_cap = 128 * 1024 * 1024
    try:
        vmem_cap = int(pltpu.get_tpu_info().vmem_capacity_bytes)
    except Exception:
        pass
    kind = ""
    try:
        kind = jax.devices()[0].device_kind.lower()
    except Exception:
        pass
    is_v7x = ("v7" in kind) or (vmem_cap <= 64 * 1024 * 1024)
    if is_v7x:
        # 64 MiB physical per TensorCore: keep blocks small, limit <= 48 MiB.
        return 24 * 1024 * 1024, 48 * 1024 * 1024, True
    # v5e/v6e: 128 MiB physical; scoped default (16/32 MiB) must be raised
    # explicitly to let the big streaming blocks through.
    return 56 * 1024 * 1024, 96 * 1024 * 1024, False


def _pick_tb(batch, c, cr, hw, x_itemsize, w_itemsize, budget_bytes,
             prefer_even_grid):
    # in + out blocks are each double-buffered by the pipeline (~4 block
    # copies); grid-invariant weights/biases are also double-buffered, so
    # charge them against the budget up front.
    weight_bytes = 2 * (2 * c * cr * w_itemsize + 2 * 4 * (c + cr))
    per_image = 4 * c * hw * x_itemsize
    budget = max(budget_bytes - weight_bytes, per_image)
    max_tb = max(1, budget // per_image)
    divisors = [tb for tb in range(min(batch, max_tb), 0, -1) if batch % tb == 0]
    if not divisors:
        return 1
    if prefer_even_grid:
        # v7x: want >= 2 (ideally even) grid steps so CORE_PARALLEL keeps both
        # TensorCores streaming without a load-imbalanced tail.
        for tb in divisors:
            g = batch // tb
            if g >= 2 and g % 2 == 0:
                return tb
        for tb in divisors:
            if batch // tb >= 2:
                return tb
    return divisors[0]


def se_layer(x, w1, b1, w2, b2):
    """SELayer forward.  x: (B, C, H, W).  PyTorch nn.Linear convention:
       w1: (C//r, C), b1: (C//r,), w2: (C, C//r), b2: (C,)."""
    B, C, H, W = x.shape
    Cr = w1.shape[0]
    HW = H * W
    x_itemsize = jnp.dtype(x.dtype).itemsize

    # Free reshape: no padding, no extra HBM pass.  Block last dims equal the
    # full array dims, so the (8,128) divisibility rule does not apply.
    x_flat = x.reshape(B, C, HW)

    # Pre-transposed weights (contraction on the lane axis) in the activation
    # dtype; tiny biases stay in f32 for the accumulate.
    param_dtype = x.dtype
    w_itemsize = jnp.dtype(param_dtype).itemsize
    w1t = w1.T.astype(param_dtype)                  # (C, Cr)
    w2t = w2.T.astype(param_dtype)                  # (Cr, C)
    b1_row = b1.reshape(1, Cr).astype(jnp.float32)
    b2_row = b2.reshape(1, C).astype(jnp.float32)

    block_budget, vmem_limit, is_v7x = _chip_params()
    TB = _pick_tb(B, C, Cr, HW, x_itemsize, w_itemsize, block_budget,
                  prefer_even_grid=is_v7x)
    grid_b = B // TB

    if is_v7x and grid_b >= 2 and hasattr(pltpu, "CORE_PARALLEL"):
        dim_sem = (pltpu.CORE_PARALLEL,)            # shard batch across 2 TCs
    else:
        dim_sem = ("parallel",)

    cost = pl.CostEstimate(
        flops=B * C * HW                 # pooling adds
              + 4 * B * C * Cr           # two FC matmuls
              + B * C * HW,              # rescale multiply
        transcendentals=0,
        bytes_accessed=2 * B * C * HW * x_itemsize
                       + 2 * C * Cr * w_itemsize + 4 * (C + Cr),
    )

    kernel = functools.partial(_se_kernel, inv_hw=1.0 / HW)

    # NOTE: weights/biases have constant index_maps (fetched once across the
    # grid).  pipeline_mode=pl.Buffered(1) would also single-buffer them; at
    # MobileNet channel counts the saving is a few MiB, negligible here.
    out_flat = pl.pallas_call(
        kernel,
        out_shape=jax.ShapeDtypeStruct((B, C, HW), x.dtype),
        grid_spec=pltpu.PrefetchScalarGridSpec(
            num_scalar_prefetch=0,
            grid=(grid_b,),
            in_specs=[
                pl.BlockSpec((TB, C, HW), lambda b: (b, 0, 0)),  # x
                pl.BlockSpec((C, Cr), lambda b: (0, 0)),         # w1^T
                pl.BlockSpec((1, Cr), lambda b: (0, 0)),         # b1
                pl.BlockSpec((Cr, C), lambda b: (0, 0)),         # w2^T
                pl.BlockSpec((1, C), lambda b: (0, 0)),          # b2
            ],
            out_specs=pl.BlockSpec((TB, C, HW), lambda b: (b, 0, 0)),
        ),
        compiler_params=pltpu.CompilerParams(
            dimension_semantics=dim_sem,
            vmem_limit_bytes=vmem_limit,
        ),
        cost_estimate=cost,
    )(x_flat, w1t, b1_row, w2t, b2_row)

    return out_flat.reshape(B, C, H, W)


def se_layer_ref(x, w1, b1, w2, b2):
    # Pure-JAX reference for correctness checking.
    y = jnp.mean(x, axis=(2, 3))                       # (B, C)
    h = jnp.maximum(y @ w1.T + b1, 0.0)                # (B, C//r)
    s = h @ w2.T + b2                                  # (B, C)
    scale = jnp.clip(s + 3.0, 0.0, 6.0) / 6.0
    return x * scale[:, :, None, None]


if __name__ == "__main__":
    key = jax.random.PRNGKey(0)

    def make_inputs(B, C, H, W, reduction=4):
        Cr = C // reduction
        kx, kw1, kb1, kw2, kb2 = jax.random.split(key, 5)
        x = jax.random.normal(kx, (B, C, H, W), dtype=jnp.float32)
        w1 = jax.random.normal(kw1, (Cr, C), dtype=jnp.float32) * 0.1
        b1 = jax.random.normal(kb1, (Cr,), dtype=jnp.float32) * 0.1
        w2 = jax.random.normal(kw2, (C, Cr), dtype=jnp.float32) * 0.1
        b2 = jax.random.normal(kb2, (C,), dtype=jnp.float32) * 0.1
        return x, w1, b1, w2, b2

    # Lane-dense spatial axis: HW = 16*16 = 256.
    args = make_inputs(2, 16, 16, 16)
    out = jax.block_until_ready(se_layer(*args))
    ref = jax.block_until_ready(se_layer_ref(*args))
    assert out.shape == args[0].shape
    assert jnp.allclose(out, ref, atol=1e-5, rtol=1e-5), \
        float(jnp.max(jnp.abs(out - ref)))

    # Non-multiple-of-128 spatial axis: HW = 7*7 = 49 streamed at its true
    # width (no padding, masked tail store only).
    args_p = make_inputs(2, 16, 7, 7)
    out_p = jax.block_until_ready(se_layer(*args_p))
    ref_p = jax.block_until_ready(se_layer_ref(*args_p))
    assert out_p.shape == args_p[0].shape
    assert jnp.allclose(out_p, ref_p, atol=1e-5, rtol=1e-5), \
        float(jnp.max(jnp.abs(out_p - ref_p)))

    print("KERNEL_OK")
</pallas_src>

<mosaic_0001>
module attributes {stable_mosaic.version = 11 : i64} {
  func.func @_se_kernel(%arg0: i32, %arg1: memref<2x16x256xf32, #tpu.memory_space<vmem>>, %arg2: memref<16x4xf32, #tpu.memory_space<vmem>>, %arg3: memref<1x4xf32, #tpu.memory_space<vmem>>, %arg4: memref<4x16xf32, #tpu.memory_space<vmem>>, %arg5: memref<1x16xf32, #tpu.memory_space<vmem>>, %arg6: memref<2x16x256xf32, #tpu.memory_space<vmem>>) attributes {dimension_semantics = [#tpu.dimension_semantics<parallel>], iteration_bounds = array<i64: 1>, scalar_prefetch = 0 : i64, scratch_operands = 0 : i64, tpu.core_type = #tpu.core_type<tc>, window_params = [{transform_indices = @transform_0, window_bounds = array<i64: 2, 16, 256>}, {pipeline_mode = #tpu.pipeline_mode<synchronous>, transform_indices = @transform_1, window_bounds = array<i64: 16, 4>}, {pipeline_mode = #tpu.pipeline_mode<synchronous>, transform_indices = @transform_2, window_bounds = array<i64: 1, 4>}, {pipeline_mode = #tpu.pipeline_mode<synchronous>, transform_indices = @transform_3, window_bounds = array<i64: 4, 16>}, {pipeline_mode = #tpu.pipeline_mode<synchronous>, transform_indices = @transform_4, window_bounds = array<i64: 1, 16>}, {transform_indices = @transform_5, window_bounds = array<i64: 2, 16, 256>}]} {
    %c0 = arith.constant 0 : index
    %c0_0 = arith.constant 0 : index
    %c0_1 = arith.constant 0 : index
    %0 = vector.load %arg1[%c0, %c0_0, %c0_1] : memref<2x16x256xf32, #tpu.memory_space<vmem>>, vector<2x16x256xf32>
    %cst = arith.constant dense<0.000000e+00> : vector<2x16xf32>
    %1 = vector.multi_reduction <add>, %0, %cst [2] : vector<2x16x256xf32> to vector<2x16xf32>
    %cst_2 = arith.constant 3.906250e-03 : f32
    %2 = vector.broadcast %cst_2 : f32 to vector<2x16xf32>
    %3 = arith.mulf %1, %2 : vector<2x16xf32>
    %c0_3 = arith.constant 0 : index
    %c0_4 = arith.constant 0 : index
    %4 = vector.load %arg2[%c0_3, %c0_4] : memref<16x4xf32, #tpu.memory_space<vmem>>, vector<16x4xf32>
    %cst_5 = arith.constant dense<0.000000e+00> : vector<2x4xf32>
    %5 = tpu.matmul %3, %4, %cst_5 {dimension_numbers = #tpu.dot_dimension_numbers<[1], [0], [0], [1], [0, 0, 1, 1], [], []>} : vector<2x16xf32>, vector<16x4xf32>, vector<2x4xf32> -> vector<2x4xf32>
    %c0_6 = arith.constant 0 : index
    %c0_7 = arith.constant 0 : index
    %6 = vector.load %arg3[%c0_6, %c0_7] : memref<1x4xf32, #tpu.memory_space<vmem>>, vector<1x4xf32>
    %7 = vector.broadcast %6 : vector<1x4xf32> to vector<2x4xf32>
    %8 = arith.addf %5, %7 : vector<2x4xf32>
    %cst_8 = arith.constant 0.000000e+00 : f32
    %9 = vector.broadcast %cst_8 : f32 to vector<2x4xf32>
    %10 = arith.maximumf %8, %9 : vector<2x4xf32>
    %c0_9 = arith.constant 0 : index
    %c0_10 = arith.constant 0 : index
    %11 = vector.load %arg4[%c0_9, %c0_10] : memref<4x16xf32, #tpu.memory_space<vmem>>, vector<4x16xf32>
    %cst_11 = arith.constant dense<0.000000e+00> : vector<2x16xf32>
    %12 = tpu.matmul %10, %11, %cst_11 {dimension_numbers = #tpu.dot_dimension_numbers<[1], [0], [0], [1], [0, 0, 1, 1], [], []>} : vector<2x4xf32>, vector<4x16xf32>, vector<2x16xf32> -> vector<2x16xf32>
    %c0_12 = arith.constant 0 : index
    %c0_13 = arith.constant 0 : index
    %13 = vector.load %arg5[%c0_12, %c0_13] : memref<1x16xf32, #tpu.memory_space<vmem>>, vector<1x16xf32>
    %14 = vector.broadcast %13 : vector<1x16xf32> to vector<2x16xf32>
    %15 = arith.addf %12, %14 : vector<2x16xf32>
    %cst_14 = arith.constant 3.000000e+00 : f32
    %16 = vector.broadcast %cst_14 : f32 to vector<2x16xf32>
    %17 = arith.addf %15, %16 : vector<2x16xf32>
    %cst_15 = arith.constant 0.000000e+00 : f32
    %cst_16 = arith.constant 6.000000e+00 : f32
    %18 = vector.broadcast %cst_15 : f32 to vector<2x16xf32>
    %19 = arith.maximumf %18, %17 : vector<2x16xf32>
    %20 = vector.broadcast %cst_16 : f32 to vector<2x16xf32>
    %21 = arith.minimumf %20, %19 : vector<2x16xf32>
    %cst_17 = arith.constant 0.166666672 : f32
    %22 = vector.broadcast %cst_17 : f32 to vector<2x16xf32>
    %23 = arith.mulf %21, %22 : vector<2x16xf32>
    %c0_18 = arith.constant 0 : index
    %c0_19 = arith.constant 0 : index
    %c0_20 = arith.constant 0 : index
    %24 = vector.load %arg1[%c0_18, %c0_19, %c0_20] : memref<2x16x256xf32, #tpu.memory_space<vmem>>, vector<2x16x256xf32>
    %25 = vector.shape_cast %23 : vector<2x16xf32> to vector<2x16x1xf32>
    %26 = vector.broadcast %25 : vector<2x16x1xf32> to vector<2x16x256xf32>
    %27 = arith.mulf %24, %26 : vector<2x16x256xf32>
    %c0_21 = arith.constant 0 : index
    %c0_22 = arith.constant 0 : index
    %c0_23 = arith.constant 0 : index
    %28 = vector.load %arg6[%c0_21, %c0_22, %c0_23] : memref<2x16x256xf32, #tpu.memory_space<vmem>>, vector<2x16x256xf32>
    tpu.vector_store %arg6[%c0_21, %c0_22, %c0_23], %27 {strides = array<i32>} : memref<2x16x256xf32, #tpu.memory_space<vmem>>, vector<2x16x256xf32>,
    return
  }
  func.func @transform_0(%arg0: i32) -> (i32, i32, i32) {
    %c0_i32 = arith.constant 0 : i32
    %c0_i32_0 = arith.constant 0 : i32
    %c0_i32_1 = arith.constant 0 : i32
    return %arg0, %c0_i32, %c0_i32_0 : i32, i32, i32
  }
  func.func @transform_1(%arg0: i32) -> (i32, i32) {
    %c0_i32 = arith.constant 0 : i32
    %c0_i32_0 = arith.constant 0 : i32
    %c0_i32_1 = arith.constant 0 : i32
    return %c0_i32, %c0_i32_0 : i32, i32
  }
  func.func @transform_2(%arg0: i32) -> (i32, i32) {
    %c0_i32 = arith.constant 0 : i32
    %c0_i32_0 = arith.constant 0 : i32
    %c0_i32_1 = arith.constant 0 : i32
    return %c0_i32, %c0_i32_0 : i32, i32
  }
  func.func @transform_3(%arg0: i32) -> (i32, i32) {
    %c0_i32 = arith.constant 0 : i32
    %c0_i32_0 = arith.constant 0 : i32
    %c0_i32_1 = arith.constant 0 : i32
    return %c0_i32, %c0_i32_0 : i32, i32
  }
  func.func @transform_4(%arg0: i32) -> (i32, i32) {
    %c0_i32 = arith.constant 0 : i32
    %c0_i32_0 = arith.constant 0 : i32
    %c0_i32_1 = arith.constant 0 : i32
    return %c0_i32, %c0_i32_0 : i32, i32
  }
  func.func @transform_5(%arg0: i32) -> (i32, i32, i32) {
    %c0_i32 = arith.constant 0 : i32
    %c0_i32_0 = arith.constant 0 : i32
    %c0_i32_1 = arith.constant 0 : i32
    return %arg0, %c0_i32, %c0_i32_0 : i32, i32, i32
  }
}

</mosaic_0001>

<bundles_post_ra>
// kernel: tpu_custom_call.1
= control target key start
LH: loop header
LB: loop body
LE: loop exit
PB: predicated region body
PF: predicated region fallthrough
CT: control target
= control target key end

     0   :  { %10 = vsyncpa [#allocation3], 0  ;;  %s696_s0 = inlined_call_operand.hbm [shape: f32[2,16,256], index: 0, kind: input, shape index: {}]   ;;  %s697_s1 = inlined_call_operand.hbm [shape: f32[16,4], index: 1, kind: input, shape index: {}]   ;;  %s698_s2 = inlined_call_operand.hbm [shape: f32[1,4], index: 2, kind: input, shape index: {}]   ;;  %s699_s3 = inlined_call_operand.hbm [shape: f32[4,16], index: 3, kind: input, shape index: {}]   ;;  %s700_s4 = inlined_call_operand.hbm [shape: f32[1,16], index: 4, kind: input, shape index: {}]   ;;  %s701_s5 = inlined_call_operand.hbm [shape: f32[2,16,256], index: 5, kind: output, shape index: {}]  }
   0x1   :  { %11 = vsyncpa [#allocation6], 0 }
   0x2   :  { %12 = vsyncpa [#allocation9], 0 }
   0x3   :  { %13 = vsyncpa [#allocation4], 0  ;;  %s543_s18 = smov [#allocation5]   ;;  %s403_s22 = scalar_lea.hbm %s697_s1, 256 }
   0x4   :  { %s31_s19 = sshll.u32 %s543_s18, 4  ;;  %p404_p0 = scmp.ne.s32.totalorder %s697_s1, %s403_s22  ;;  %s32_s19 = int_to_ptr.vmem [resolvable:$true] %s31_s19 }
   0x5   :  { %p407_p1 = scmp.lt.u32.totalorder %s403_s22, %s697_s1 }
   0x7   :  { %p409_p2 = pnand %p407_p1, %p404_p0 }
   0x9   :  { %412 = shalt.err (!%p409_p2)
}
   0xa   :  { %s413_s27 = scalar_lea.vmem %s32_s19, 256  ;;  %p418_p4 = scmp.lt.s32.totalorder %s32_s19, %s32_s19 }
   0xb   :  { %p414_p3 = scmp.ne.s32.totalorder %s32_s19, %s413_s27  ;;  %p419_p5 = scmp.lt.s32.totalorder %s413_s27, %s413_s27 }
   0xd   :  { %p420_p6 = por %p419_p5, %p418_p4 }
   0xf   :  { %p421_p7 = pnand %p420_p6, %p414_p3 }
  0x11   :  { %424 = shalt.err (!%p421_p7)
}
  0x12   :  { %s544_s28 = smov 128   ;;  %s545_s29 = smov 8  }
  0x13   :  { %37 = dma.hbm_to_vmem [thread:$0]  %s697_s1, 256, %s32_s19, [#allocation6], %s544_s28, %s544_s28, %s545_s29  }
  0x14   :  { %s546_s7 = smov [#allocation8]   ;;  %s547_s9 = smov [#allocation2]  }
  0x15   :  { %s54_s8 = sshll.u32 %s546_s7, 4  ;;  %s19_s10 = sshll.u32 %s547_s9, 4  ;;  %s55_s8 = int_to_ptr.vmem [resolvable:$true] %s54_s8  ;;  %s20_s10 = int_to_ptr.vmem [resolvable:$true] %s19_s10 }
  0x16   :  { %s425_s13 = scalar_lea.hbm %s699_s3, 64 }
  0x17   :  { %p426_p8 = scmp.ne.s32.totalorder %s699_s3, %s425_s13  ;;  %p429_p9 = scmp.lt.u32.totalorder %s425_s13, %s699_s3 }
  0x19   :  { %p431_p10 = pnand %p429_p9, %p426_p8 }
  0x1b   :  { %434 = shalt.err (!%p431_p10)
}
  0x1c   :  { %s435_s1 = scalar_lea.vmem %s55_s8, 64  ;;  %p440_p12 = scmp.lt.s32.totalorder %s55_s8, %s55_s8 }
  0x1d   :  { %p436_p11 = scmp.ne.s32.totalorder %s55_s8, %s435_s1  ;;  %p441_p13 = scmp.lt.s32.totalorder %s435_s1, %s435_s1 }
  0x1f   :  { %p442_p0 = por %p441_p13, %p440_p12 }
  0x21   :  { %p443_p1 = pnand %p442_p0, %p436_p11 }
  0x23   :  { %446 = shalt.err (!%p443_p1)
}
  0x24   :  { %57 = dma.hbm_to_vmem [thread:$0]  %s699_s3, 64, %s55_s8, [#allocation9]  }
  0x25   :  { %s447_s22 = scalar_lea.hbm %s696_s0, 1024 }
  0x26   :  { %p448_p2 = scmp.ne.s32.totalorder %s696_s0, %s447_s22  ;;  %p451_p3 = scmp.lt.u32.totalorder %s447_s22, %s696_s0 }
  0x28   :  { %p453_p4 = pnand %p451_p3, %p448_p2 }
  0x2a   :  { %456 = shalt.err (!%p453_p4)
}
  0x2b   :  { %s457_s27 = scalar_lea.vmem %s20_s10, 1024  ;;  %p462_p6 = scmp.lt.s32.totalorder %s20_s10, %s20_s10 }
  0x2c   :  { %p458_p5 = scmp.ne.s32.totalorder %s20_s10, %s457_s27  ;;  %p463_p7 = scmp.lt.s32.totalorder %s457_s27, %s457_s27 }
  0x2e   :  { %p464_p8 = por %p463_p7, %p462_p6 }
  0x30   :  { %p465_p9 = pnand %p464_p8, %p458_p5 }
  0x32   :  { %468 = shalt.err (!%p465_p9)
}
  0x33   :  { %s548_s3 = smov 256   ;;  %s549_s28 = smov 16  }
  0x34   :  { %25 = dma.hbm_to_vmem [thread:$0]  %s696_s0, 1024, %s20_s10, [#allocation3], %s548_s3, %s548_s3, %s549_s28  }
  0x35   :  { %s550_s6 = smov [#allocation7]   ;;  %s551_s8 = smov [#allocation10]  }
  0x36   :  { %s44_s7 = sshll.u32 %s550_s6, 4  ;;  %s64_s9 = sshll.u32 %s551_s8, 4  ;;  %s45_s7 = int_to_ptr.vmem [resolvable:$true] %s44_s7  ;;  %s65_s9 = int_to_ptr.vmem [resolvable:$true] %s64_s9 }
  0x37   :  { %s469_s13 = scalar_lea.hbm %s698_s2, 16 }
  0x38   :  { %p470_p10 = scmp.ne.s32.totalorder %s698_s2, %s469_s13  ;;  %p473_p11 = scmp.lt.u32.totalorder %s469_s13, %s698_s2 }
  0x3a   :  { %p475_p12 = pnand %p473_p11, %p470_p10 }
  0x3c   :  { %478 = shalt.err (!%p475_p12)
}
  0x3d   :  { %s479_s0 = scalar_lea.vmem %s45_s7, 16  ;;  %s483_s10 = scalar_lea.vmem %s45_s7, 32 }
  0x3e   :  { %p480_p13 = scmp.ne.s32.totalorder %s45_s7, %s479_s0  ;;  %p484_p0 = scmp.lt.s32.totalorder %s45_s7, %s45_s7 }
  0x3f   :  { %p485_p1 = scmp.lt.s32.totalorder %s483_s10, %s479_s0 }
  0x41   :  { %p486_p2 = por %p485_p1, %p484_p0 }
  0x43   :  { %p487_p3 = pnand %p486_p2, %p480_p13 }
  0x45   :  { %490 = shalt.err (!%p487_p3)
}
  0x46   :  { %47 = dma.hbm_to_vmem [thread:$0]  %s698_s2, 16, %s45_s7, [#allocation6]  }
  0x47   :  { %s491_s21 = scalar_lea.hbm %s700_s4, 16 }
  0x48   :  { %p492_p4 = scmp.ne.s32.totalorder %s700_s4, %s491_s21  ;;  %p495_p5 = scmp.lt.u32.totalorder %s491_s21, %s700_s4 }
  0x4a   :  { %p497_p6 = pnand %p495_p5, %p492_p4 }
  0x4c   :  { %500 = shalt.err (!%p497_p6)
}
  0x4d   :  { %s501_s26 = scalar_lea.vmem %s65_s9, 16  ;;  %s505_s27 = scalar_lea.vmem %s65_s9, 32 }
  0x4e   :  { %p502_p7 = scmp.ne.s32.totalorder %s65_s9, %s501_s26  ;;  %p506_p8 = scmp.lt.s32.totalorder %s65_s9, %s65_s9 }
  0x4f   :  { %p507_p9 = scmp.lt.s32.totalorder %s505_s27, %s501_s26 }
  0x51   :  { %p508_p10 = por %p507_p9, %p506_p8 }
  0x53   :  { %p509_p11 = pnand %p508_p10, %p502_p7 }
  0x55   :  { %512 = shalt.err (!%p509_p11)
}
  0x56   :  { %67 = dma.hbm_to_vmem [thread:$0]  %s700_s4, 16, %s65_s9, [#allocation9]  }
  0x57   :  { %535 = dma.done.wait [#allocation3], 1024  }
  0x58   :  { %536 = vsyncadd [#allocation3], 4294966272 }
  0x59   :  { %537 = dma.done.wait [#allocation6], 272  }
  0x5a   :  { %538 = vsyncadd [#allocation6], 4294967024 }
  0x5b   :  { %539 = dma.done.wait [#allocation9], 80  }
  0x5c   :  { %540 = vsyncadd [#allocation9], 4294967216  ;;  %v649_v0 = vld [vmem:[#allocation2 + $0x20] sm:$0xff]  ;;  %v651_v1 = vld [vmem:[#allocation2 + $0x28] sm:$0xff]  ;;  %v552_v15 = vmov 0.0|0.0   ;;  %vm553_vm0 = vmmov 0   ;;  %v120_v17 = vlaneseq }
  0x5d   :  { %v653_v2 = vld [vmem:[#allocation2] sm:$0xff]  ;;  %v97_v3 = vadd.f32 %v651_v1, %v649_v0  ;;  %v657_v4 = vld [vmem:[#allocation2 + $0x8] sm:$0xff]  ;;  %v659_v5 = vld [vmem:[#allocation2 + $0x30] sm:$0xff]  ;;  %387 = vmatprep.subr.bf16.mxu0 %v552_v15  ;;  %v554_v16 = vmov 0.0   ;;  %vm131_vm1 = vcmask 130112   ;;  %vm142_vm2 = vcmask 1041409  }
  0x5e   :  { %v661_v6 = vld [vmem:[#allocation2 + $0x38] sm:$0xff]  ;;  %v91_v7 = vadd.f32 %v657_v4, %v653_v2  ;;  %v665_v8 = vld [vmem:[#allocation2 + $0x10] sm:$0xff]  ;;  %v107_v12 = vld [vmem:[#allocation5] sm:$0xff]  ;;  %379 = vmatprep.mubr.msk.f32.mxu0 %vm553_vm0, %v554_v16  ;;  %382 = vmatprep.subr.mxu1 %v554_v16  ;;  %v121_v18 = vand.u32 127, %v120_v17  ;;  %v123_v19 = vshrl.u32 %v120_v17, 7  ;;  %vm144_vm3 = vcmask 130048  }
  0x5f   :  { %v667_v9 = vld [vmem:[#allocation2 + $0x18] sm:$0xff]  ;;  %98 = vadd.xlane.f32.xlu1 %v97_v3  ;;  %v100_v10 = vadd.f32 %v661_v6, %v659_v5  ;;  %v108_v13 = vld [vmem:[#allocation5 + $0x8] sm:$0xff]  ;;  %384 = vmatprep.mubr.msk.f32.mxu1 %vm553_vm0, %v554_v16  ;;  %v218_v38 = vld [vmem:[#allocation8] sm:$0xf]  ;;  %vm230_vm4 = vcmask 1043456   ;;  %vm226_vm5 = vcmask 31744  }
  0x60   :  { %92 = vadd.xlane.f32.xlu0 %v91_v7  ;;  %v94_v11 = vadd.f32 %v667_v9, %v665_v8  ;;  %v388_v14 = vpack.c.bf16 %v108_v13, %v107_v12  ;;  %v126_v20 = vadd.s32 4294967288, %v121_v18  ;;  %v124_v23 = vsub.s32 %v121_v18, %v123_v19  ;;  %383 = vmatpush3.msk.msra.mxu1 %vm230_vm4, %v218_v38  ;;  %v365_v39 = vld [vmem:[#allocation7] ss:$0 sm:$0xff]  ;;  %v367_v44 = vld [vmem:[#allocation10] ss:$0 sm:$0xff]  ;;  %s555_s4 = smov [#allocation11]  }
  0x61   :  { %v310_v51 = vsub.s32 0, %v123_v19  ;;  %v321_v54 = vsub.s32 1, %v123_v19  ;;  %s351_s30 = sshll.u32 %s555_s4, 4  ;;  %s352_s30 = int_to_ptr.vmem [resolvable:$true] %s351_s30 }
  0x62   :  { %389 = vmatpush3.bf16.msra.mxu0 %v388_v14  ;;  %v129_v25 = vsub.s32 %v126_v20, %v123_v19  ;;  %s513_s6 = scalar_lea.vmem %s352_s30, 1024  ;;  %p518_p13 = scmp.lt.s32.totalorder %s352_s30, %s352_s30 }
  0x63   :  { %101 = vadd.xlane.f32.xlu1 %v100_v10  ;;  %p514_p12 = scmp.ne.s32.totalorder %s352_s30, %s513_s6  ;;  %p519_p0 = scmp.lt.s32.totalorder %s513_s6, %s513_s6 }
  0x64   :  { %95 = vadd.xlane.f32.xlu0 %v94_v11 }
  0x65   :  { %p520_p1 = por %p519_p0, %p518_p13 }
  0x67   :  { %p521_p2 = pnand %p520_p1, %p514_p12 }
  0xec   :  { %v99_v21 = vpop.xlane.xlu1 %98 }
  0xed   :  { %v93_v22 = vpop.xlane.xlu0 %92  ;;  %v105_v24 = vmul.f32 0.00390625, %v99_v21 }
  0xee   :  { %v103_v26 = vmul.f32 0.00390625, %v93_v22 }
  0xef   :  { %v136_v31 = vrot.slane %v105_v24, %v124_v23 }
  0xf0   :  { %v102_v27 = vpop.xlane.xlu1 %101  ;;  %v125_v33 = vrot.slane %v103_v26, %v124_v23 }
  0xf1   :  { %v106_v28 = vmul.f32 0.00390625, %v102_v27  ;;  %v96_v29 = vpop.xlane.xlu0 %95 }
  0xf2   :  { %v104_v30 = vmul.f32 0.00390625, %v96_v29 }
  0xf3   :  { %v140_v32 = vrot.slane %v106_v28, %v129_v25 }
  0xf4   :  { %v130_v34 = vrot.slane %v104_v30, %v129_v25 }
  0xf5   :  { %v141_v35 = vsel %vm131_vm1, %v140_v32, %v136_v31 }
  0xf6   :  { %v132_v36 = vsel %vm131_vm1, %v130_v34, %v125_v33 }
  0xf7   :  { %v143_v37 = vsel %vm142_vm2, %v141_v35, %v132_v36 }
  0xf8   :  { %380 = vmatmul.mubr.msk.f32.vlgmr.msra.gmra.mrb[0].mxu0 %vm144_vm3, %v143_v37 }
 0x1cb   :  { %v213_v40 = vpop.f32.mrb[0].mxu0 }
 0x1cc   :  { %v214_v41 = vadd.f32 %v365_v39, %v213_v40  ;;  %v381_v42 = vpop.f32.mrb[1].mxu0 }
 0x1ce   :  { %v217_v43 = vmax.f32 %v214_v41, 0.0 }
 0x1d0   :  { %385 = vmatmul.mubr.msk.f32.vlgmr.msra.gmra.mrb[0].mxu1 %vm226_vm5, %v217_v43 }
 0x2a3   :  { %v300_v45 = vpop.f32.mrb[0].mxu1 }
 0x2a4   :  { %v301_v46 = vadd.f32 %v367_v44, %v300_v45  ;;  %v386_v47 = vpop.f32.mrb[1].mxu1 }
 0x2a6   :  { %v304_v48 = vadd.f32 3.0, %v301_v46 }
 0x2a8   :  { %v305_v49 = vmax.f32 %v304_v48, 0.0 }
 0x2aa   :  { %v306_v50 = vmin.f32 %v305_v49, 6.0 }
 0x2ac   :  { %v307_v52 = vmul.f32 0.16666667, %v306_v50 }
 0x2ae   :  { %v311_v53 = vrot.slane %v307_v52, %v310_v51  ;;  %v322_v55 = vrot.slane %v307_v52, %v321_v54 }
 0x2b0   :  { %317 = vbcast.lane.b32.xlu1 %v311_v53, 264  ;;  %313 = vbcast.lane.b32.xlu0 %v311_v53, 256 }
 0x2b4   :  { %324 = vbcast.lane.b32.xlu1 %v322_v55, 256 }
 0x2b8   :  { %328 = vbcast.lane.b32.xlu1 %v322_v55, 264 }
 0x322   :  { %v318_v56 = vpop.permute.xlu1 %317  ;;  %v314_v57 = vpop.permute.xlu0 %313 }
 0x323   :  { %v332_v58 = vmul.f32 %v318_v56, %v665_v8  ;;  %v333_v59 = vmul.f32 %v318_v56, %v667_v9  ;;  %v330_v60 = vmul.f32 %v314_v57, %v653_v2  ;;  %v331_v61 = vmul.f32 %v314_v57, %v657_v4 }
 0x325   :  { %340 = vst [vmem:[#allocation11 + $0x10] sm:$0xff] %v332_v58  ;;  %341 = vst [vmem:[#allocation11 + $0x18] sm:$0xff] %v333_v59 }
 0x326   :  { %338 = vst [vmem:[#allocation11] sm:$0xff] %v330_v60  ;;  %339 = vst [vmem:[#allocation11 + $0x8] sm:$0xff] %v331_v61  ;;  %v325_v62 = vpop.permute.xlu1 %324 }
 0x327   :  { %v334_v63 = vmul.f32 %v325_v62, %v649_v0  ;;  %v335_v3 = vmul.f32 %v325_v62, %v651_v1 }
 0x329   :  { %342 = vst [vmem:[#allocation11 + $0x20] sm:$0xff] %v334_v63  ;;  %343 = vst [vmem:[#allocation11 + $0x28] sm:$0xff] %v335_v3 }
 0x32a   :  { %v329_v7 = vpop.permute.xlu1 %328 }
 0x32b   :  { %v336_v8 = vmul.f32 %v329_v7, %v659_v5  ;;  %v337_v2 = vmul.f32 %v329_v7, %v661_v6 }
 0x32d   :  { %344 = vst [vmem:[#allocation11 + $0x30] sm:$0xff] %v336_v8  ;;  %345 = vst [vmem:[#allocation11 + $0x38] sm:$0xff] %v337_v2 }
 0x32e   :  { %524 = shalt.err (!%p521_p2)
}
 0x32f   :  { %s525_s9 = scalar_lea.hbm %s701_s5, 1024 }
 0x330   :  { %p526_p3 = scmp.ne.s32.totalorder %s701_s5, %s525_s9  ;;  %p529_p4 = scmp.lt.u32.totalorder %s525_s9, %s701_s5 }
 0x332   :  { %p531_p5 = pnand %p529_p4, %p526_p3 }
 0x334   :  { %534 = shalt.err (!%p531_p5)
}
 0x335   :  { %357 = dma.vmem_to_hbm [thread:$0]  %s352_s30, 1024, %s701_s5, [#allocation4], %s548_s3, %s548_s3, %s549_s28  }
 0x336   :  { %541 = dma.done.wait [#allocation4], 1024  }
 0x337   :  { %542 = vsyncadd [#allocation4], 4294966272 }
 0x338   :  { %361 = vsyncpa [#allocation3], 1 }
 0x339   :  { %362 = vsyncpa [#allocation6], 1 }
 0x33a   :  { %363 = vsyncpa [#allocation9], 1 }
 0x33b   :  { %364 = vsyncpa [#allocation4], 1 }

</bundles_post_ra>
